<compile_context>
chip_gen: v5e
topology: v5e:2x2
jax: 0.10.0
libtpu: 0.0.40
codegen_flags: <defaults>
</compile_context>

<pallas_src>
import functools

import jax
import jax.numpy as jnp
from jax import lax
from jax.experimental import pallas as pl
from jax.experimental.pallas import tpu as pltpu

KSIZE = 3
BN_EPS = 1e-5


# --------------------------------------------------------------------------- #
# Kernels
# --------------------------------------------------------------------------- #
def _conv_stats_kernel(p_ref, w_ref, conv_ref, sum_ref, ssq_ref):
    """Conv-as-matmul for one pixel tile + per-tile per-channel partial stats.

    p_ref:    (K_pad, TP)     im2col patch tile, pixels on lanes (bf16 / f32)
    w_ref:    (Cout, K_pad)   folded conv weights, resident across the grid
    conv_ref: (Cout, TP)      raw conv output tile (f32)
    sum_ref:  (1, Cout, 1)    per-tile per-channel sum       (f32)
    ssq_ref:  (1, Cout, 1)    per-tile per-channel sum(x^2)  (f32)
    """
    acc = jnp.dot(w_ref[...], p_ref[...], preferred_element_type=jnp.float32)
    conv_ref[...] = acc
    # Lane (XLU) reductions -- cheap, separate slot from the MXU/VPU work.
    sum_ref[...] = jnp.sum(acc, axis=1, keepdims=True)[None]
    ssq_ref[...] = jnp.sum(acc * acc, axis=1, keepdims=True)[None]


def _bn_relu_kernel(x_ref, scale_ref, shift_ref, o_ref):
    """In-place BN affine + ReLU:  o = max(x*scale + shift, 0)."""
    o_ref[...] = jnp.maximum(x_ref[...] * scale_ref[...] + shift_ref[...], 0.0)


# --------------------------------------------------------------------------- #
# Tiling helpers
# --------------------------------------------------------------------------- #
def _round_up(x, m):
    return (x + m - 1) // m * m


def _vmem_capacity_bytes():
    """Generation-aware VMEM capacity; conservative (v7x) fallback."""
    try:
        return int(pltpu.get_tpu_info().vmem_capacity_bytes)
    except Exception:  # not on TPU / API unavailable
        return 64 * 1024 * 1024


def _pick_pixel_tile(n_pix, target, bytes_per_pixel, vmem_budget):
    """Largest multiple of 128 <= target that fits the per-tile VMEM budget."""
    cap = max(128, vmem_budget // max(bytes_per_pixel, 1) // 128 * 128)
    tp = min(target, cap, _round_up(n_pix, 128))
    return max(128, tp // 128 * 128)


# --------------------------------------------------------------------------- #
# Wrapper
# --------------------------------------------------------------------------- #
@functools.partial(jax.jit, static_argnames=("pixel_tile", "matmul_dtype"))
def basic_conv(x_nchw, w_oihw, bias, gamma, beta, *,
               pixel_tile=32768, matmul_dtype=jnp.bfloat16):
    """BasicConv forward: (N, Cin, H, W) f32 -> (N, Cout, H, W) f32.

    `bias` is accepted for parity with nn.Conv2d(bias=True) but unused: a
    per-channel bias is exactly cancelled by train-mode BatchNorm's mean
    subtraction.  `matmul_dtype` controls only the MXU operand dtype; the
    accumulator and all BN statistics / affine math remain f32.
    """
    N, Cin, H, W = x_nchw.shape
    Cout = w_oihw.shape[0]
    K = KSIZE * KSIZE * Cin
    K_pad = _round_up(K, 8)              # 36 -> 40: unmasked sublane handling
    n_pix = N * H * W
    del bias                             # cancelled by train-mode BN (see doc)

    # ---- Tile sizing: big lane-dense tiles, generation-aware VMEM cap ------
    elt = jnp.finfo(matmul_dtype).bits // 8
    vmem_cap = _vmem_capacity_bytes()
    bpp_a = K_pad * elt * 2 + Cout * 4 * 2      # dbl-buffered patches + conv out
    bpp_b = Cout * 4 * 4                        # dbl-buffered in + out (call B)
    tp = _pick_pixel_tile(n_pix, pixel_tile, max(bpp_a, bpp_b),
                          int(vmem_cap * 0.4))
    n_pix_pad = _round_up(n_pix, tp)
    n_tiles = n_pix_pad // tp
    vmem_limit = int(vmem_cap * 0.9)

    # ---- Layout prep (cheap XLA ops; (K, n_pix) built directly, no .T) -----
    x_cf = jnp.transpose(x_nchw, (1, 0, 2, 3)).astype(jnp.float32)  # (Cin,N,H,W)
    x_pad = jnp.pad(x_cf, ((0, 0), (0, 0), (1, 1), (1, 1)))
    patches = jnp.stack(
        [x_pad[:, :, dy:dy + H, dx:dx + W]
         for dy in range(KSIZE) for dx in range(KSIZE)], axis=0)    # (9,Cin,N,H,W)
    patches = patches.reshape(K, n_pix)
    patches = jnp.pad(patches, ((0, K_pad - K), (0, n_pix_pad - n_pix)))
    patches = patches.astype(matmul_dtype)

    # (Cout,Cin,kh,kw) -> (Cout,kh,kw,Cin) -> (Cout, 9*Cin); the K ordering
    # ((kh*3+kw)*Cin + cin) matches the patch stacking above.
    w_mat = jnp.transpose(w_oihw, (0, 2, 3, 1)).reshape(Cout, K)
    w_mat = jnp.pad(w_mat.astype(jnp.float32), ((0, 0), (0, K_pad - K)))
    w_mat = w_mat.astype(matmul_dtype)

    # ---- Call A: conv + per-tile partial statistics -------------------------
    conv, sums, ssqs = pl.pallas_call(
        _conv_stats_kernel,
        out_shape=(jax.ShapeDtypeStruct((Cout, n_pix_pad), jnp.float32),
                   jax.ShapeDtypeStruct((n_tiles, Cout, 1), jnp.float32),
                   jax.ShapeDtypeStruct((n_tiles, Cout, 1), jnp.float32)),
        grid_spec=pltpu.PrefetchScalarGridSpec(
            num_scalar_prefetch=0,
            grid=(n_tiles,),
            in_specs=[
                pl.BlockSpec((K_pad, tp), lambda t: (0, t)),       # patches
                pl.BlockSpec((Cout, K_pad), lambda t: (0, 0)),     # weights
            ],
            out_specs=[
                pl.BlockSpec((Cout, tp), lambda t: (0, t)),        # conv out
                pl.BlockSpec((1, Cout, 1), lambda t: (t, 0, 0)),   # partial sum
                pl.BlockSpec((1, Cout, 1), lambda t: (t, 0, 0)),   # partial ssq
            ],
        ),
        compiler_params=pltpu.CompilerParams(
            dimension_semantics=("parallel",),      # per-tile independent work
            vmem_limit_bytes=vmem_limit),
    )(patches, w_mat)

    # ---- Tiny XLA reduction: fold BN into per-channel scale / shift --------
    inv_count = 1.0 / float(n_pix)                  # real pixel count, not padded
    sum_c = jnp.sum(sums, axis=0)                   # (Cout, 1)
    ssq_c = jnp.sum(ssqs, axis=0)                   # (Cout, 1)
    mean = sum_c * inv_count
    # One-pass biased variance, guarded against tiny negative cancellation.
    # TODO(synk): for activations with huge mean/std ratios a two-pass variance
    # over the stored conv output would be numerically safer.
    var = jnp.maximum(ssq_c * inv_count - mean * mean, 0.0)
    scale = gamma.astype(jnp.float32).reshape(Cout, 1) * lax.rsqrt(var + BN_EPS)
    shift = beta.astype(jnp.float32).reshape(Cout, 1) - mean * scale

    # ---- Call B: in-place BN affine + ReLU ----------------------------------
    out = pl.pallas_call(
        _bn_relu_kernel,
        out_shape=jax.ShapeDtypeStruct((Cout, n_pix_pad), jnp.float32),
        grid_spec=pltpu.PrefetchScalarGridSpec(
            num_scalar_prefetch=0,
            grid=(n_tiles,),
            in_specs=[
                pl.BlockSpec((Cout, tp), lambda t: (0, t)),        # conv tile
                pl.BlockSpec((Cout, 1), lambda t: (0, 0)),         # scale
                pl.BlockSpec((Cout, 1), lambda t: (0, 0)),         # shift
            ],
            out_specs=pl.BlockSpec((Cout, tp), lambda t: (0, t)),
        ),
        input_output_aliases={0: 0},                # overwrite conv in place
        compiler_params=pltpu.CompilerParams(
            dimension_semantics=("parallel",),
            vmem_limit_bytes=vmem_limit),
    )(conv, scale, shift)

    # (Cout, n_pix) -> (N, Cout, H, W).  Kept only to honor the PyTorch NCHW
    # contract; a fused consumer could take the lane-dense (Cout, N*H*W) slab.
    out = out[:, :n_pix].reshape(Cout, N, H, W)
    return jnp.transpose(out, (1, 0, 2, 3))


# --------------------------------------------------------------------------- #
# Pure-JAX reference (module semantics: conv+bias, train-mode BN, ReLU)
# --------------------------------------------------------------------------- #
def _reference(x_nchw, w_oihw, bias, gamma, beta):
    x_nhwc = jnp.transpose(x_nchw, (0, 2, 3, 1))
    w_hwio = jnp.transpose(w_oihw, (2, 3, 1, 0))
    y = lax.conv_general_dilated(
        x_nhwc, w_hwio, window_strides=(1, 1), padding="SAME",
        dimension_numbers=("NHWC", "HWIO", "NHWC"))
    y = y + bias.reshape(1, 1, 1, -1)
    mean = jnp.mean(y, axis=(0, 1, 2), keepdims=True)
    var = jnp.mean((y - mean) ** 2, axis=(0, 1, 2), keepdims=True)
    y = (y - mean) * lax.rsqrt(var + BN_EPS)
    y = y * gamma.reshape(1, 1, 1, -1) + beta.reshape(1, 1, 1, -1)
    return jnp.transpose(jnp.maximum(y, 0.0), (0, 3, 1, 2))


if __name__ == "__main__":
    # Small shapes consistent with the module: batch=2, ch_in=4, ch_out=8, 16x16.
    N, CH_IN, CH_OUT, H, W = 2, 4, 8, 16, 16

    key = jax.random.PRNGKey(0)
    kx, kw, kb, kg, kbe = jax.random.split(key, 5)

    x = jax.random.normal(kx, (N, CH_IN, H, W), dtype=jnp.float32)
    # Conv2d(ch_in, ch_out, kernel_size=3, bias=True) parameter shapes.
    w = jax.random.normal(kw, (CH_OUT, CH_IN, KSIZE, KSIZE), dtype=jnp.float32) * 0.1
    b = jax.random.normal(kb, (CH_OUT,), dtype=jnp.float32) * 0.1
    # BatchNorm2d(ch_out) affine parameters (deterministic, non-trivial).
    gamma = 1.0 + 0.1 * jax.random.normal(kg, (CH_OUT,), dtype=jnp.float32)
    beta = 0.1 * jax.random.normal(kbe, (CH_OUT,), dtype=jnp.float32)

    ref = jax.block_until_ready(_reference(x, w, b, gamma, beta))

    # Default fast path: bf16 MXU operands, single pixel tile for this size.
    # Tolerance accommodates bf16 operand rounding (~1e-2 abs after BN).
    out = jax.block_until_ready(basic_conv(x, w, b, gamma, beta))
    assert out.shape == (N, CH_OUT, H, W)
    assert jnp.allclose(out, ref, atol=5e-2, rtol=5e-2), (
        float(jnp.max(jnp.abs(out - ref))))

    # Multi-tile path (pixel_tile=256 -> 2 tiles): exercises the per-tile
    # partial-stat emission, the XLA combine, and the parallel tile axis.
    out_tiled = jax.block_until_ready(
        basic_conv(x, w, b, gamma, beta, pixel_tile=256,
                   matmul_dtype=jnp.float32))
    assert jnp.allclose(out_tiled, ref, atol=5e-2, rtol=5e-2), (
        float(jnp.max(jnp.abs(out_tiled - ref))))

    print("KERNEL_OK")
</pallas_src>

<mosaic_0001>
module attributes {stable_mosaic.version = 11 : i64} {
  func.func @_conv_stats_kernel(%arg0: i32, %arg1: memref<40x512xbf16, #tpu.memory_space<vmem>>, %arg2: memref<8x40xbf16, #tpu.memory_space<vmem>>, %arg3: memref<8x512xf32, #tpu.memory_space<vmem>>, %arg4: memref<1x8x1xf32, #tpu.memory_space<vmem>>, %arg5: memref<1x8x1xf32, #tpu.memory_space<vmem>>) attributes {dimension_semantics = [#tpu.dimension_semantics<parallel>], iteration_bounds = array<i64: 1>, scalar_prefetch = 0 : i64, scratch_operands = 0 : i64, tpu.core_type = #tpu.core_type<tc>, window_params = [{transform_indices = @transform_0, window_bounds = array<i64: 40, 512>}, {pipeline_mode = #tpu.pipeline_mode<synchronous>, transform_indices = @transform_1, window_bounds = array<i64: 8, 40>}, {transform_indices = @transform_2, window_bounds = array<i64: 8, 512>}, {transform_indices = @transform_3, window_bounds = array<i64: 1, 8, 1>}, {transform_indices = @transform_4, window_bounds = array<i64: 1, 8, 1>}]} {
    %c0 = arith.constant 0 : index
    %c0_0 = arith.constant 0 : index
    %0 = vector.load %arg2[%c0, %c0_0] : memref<8x40xbf16, #tpu.memory_space<vmem>>, vector<8x40xbf16>
    %c0_1 = arith.constant 0 : index
    %c0_2 = arith.constant 0 : index
    %1 = vector.load %arg1[%c0_1, %c0_2] : memref<40x512xbf16, #tpu.memory_space<vmem>>, vector<40x512xbf16>
    %cst = arith.constant dense<0.000000e+00> : vector<8x512xf32>
    %2 = tpu.matmul %0, %1, %cst {dimension_numbers = #tpu.dot_dimension_numbers<[1], [0], [0], [1], [0, 0, 1, 1], [], []>} : vector<8x40xbf16>, vector<40x512xbf16>, vector<8x512xf32> -> vector<8x512xf32>
    %c0_3 = arith.constant 0 : index
    %c0_4 = arith.constant 0 : index
    %3 = vector.load %arg3[%c0_3, %c0_4] : memref<8x512xf32, #tpu.memory_space<vmem>>, vector<8x512xf32>
    tpu.vector_store %arg3[%c0_3, %c0_4], %2 {strides = array<i32>} : memref<8x512xf32, #tpu.memory_space<vmem>>, vector<8x512xf32>,
    %cst_5 = arith.constant dense<0.000000e+00> : vector<8xf32>
    %4 = vector.multi_reduction <add>, %2, %cst_5 [1] : vector<8x512xf32> to vector<8xf32>
    %5 = vector.shape_cast %4 : vector<8xf32> to vector<8x1xf32>
    %6 = vector.shape_cast %5 : vector<8x1xf32> to vector<1x8x1xf32>
    %c0_6 = arith.constant 0 : index
    %c0_7 = arith.constant 0 : index
    %c0_8 = arith.constant 0 : index
    %7 = vector.load %arg4[%c0_6, %c0_7, %c0_8] : memref<1x8x1xf32, #tpu.memory_space<vmem>>, vector<1x8x1xf32>
    tpu.vector_store %arg4[%c0_6, %c0_7, %c0_8], %6 {strides = array<i32>} : memref<1x8x1xf32, #tpu.memory_space<vmem>>, vector<1x8x1xf32>,
    %8 = arith.mulf %2, %2 : vector<8x512xf32>
    %cst_9 = arith.constant dense<0.000000e+00> : vector<8xf32>
    %9 = vector.multi_reduction <add>, %8, %cst_9 [1] : vector<8x512xf32> to vector<8xf32>
    %10 = vector.shape_cast %9 : vector<8xf32> to vector<8x1xf32>
    %11 = vector.shape_cast %10 : vector<8x1xf32> to vector<1x8x1xf32>
    %c0_10 = arith.constant 0 : index
    %c0_11 = arith.constant 0 : index
    %c0_12 = arith.constant 0 : index
    %12 = vector.load %arg5[%c0_10, %c0_11, %c0_12] : memref<1x8x1xf32, #tpu.memory_space<vmem>>, vector<1x8x1xf32>
    tpu.vector_store %arg5[%c0_10, %c0_11, %c0_12], %11 {strides = array<i32>} : memref<1x8x1xf32, #tpu.memory_space<vmem>>, vector<1x8x1xf32>,
    return
  }
  func.func @transform_0(%arg0: i32) -> (i32, i32) {
    %c0_i32 = arith.constant 0 : i32
    %c0_i32_0 = arith.constant 0 : i32
    return %c0_i32, %arg0 : i32, i32
  }
  func.func @transform_1(%arg0: i32) -> (i32, i32) {
    %c0_i32 = arith.constant 0 : i32
    %c0_i32_0 = arith.constant 0 : i32
    %c0_i32_1 = arith.constant 0 : i32
    return %c0_i32, %c0_i32_0 : i32, i32
  }
  func.func @transform_2(%arg0: i32) -> (i32, i32) {
    %c0_i32 = arith.constant 0 : i32
    %c0_i32_0 = arith.constant 0 : i32
    return %c0_i32, %arg0 : i32, i32
  }
  func.func @transform_3(%arg0: i32) -> (i32, i32, i32) {
    %c0_i32 = arith.constant 0 : i32
    %c0_i32_0 = arith.constant 0 : i32
    %c0_i32_1 = arith.constant 0 : i32
    return %arg0, %c0_i32, %c0_i32_0 : i32, i32, i32
  }
  func.func @transform_4(%arg0: i32) -> (i32, i32, i32) {
    %c0_i32 = arith.constant 0 : i32
    %c0_i32_0 = arith.constant 0 : i32
    %c0_i32_1 = arith.constant 0 : i32
    return %arg0, %c0_i32, %c0_i32_0 : i32, i32, i32
  }
}

module attributes {stable_mosaic.version = 11 : i64} {
  func.func @_bn_relu_kernel(%arg0: i32, %arg1: memref<8x512xf32, #tpu.memory_space<vmem>>, %arg2: memref<8x1xf32, #tpu.memory_space<vmem>>, %arg3: memref<8x1xf32, #tpu.memory_space<vmem>>, %arg4: memref<8x512xf32, #tpu.memory_space<vmem>>) attributes {dimension_semantics = [#tpu.dimension_semantics<parallel>], iteration_bounds = array<i64: 1>, scalar_prefetch = 0 : i64, scratch_operands = 0 : i64, tpu.core_type = #tpu.core_type<tc>, window_params = [{transform_indices = @transform_0, window_bounds = array<i64: 8, 512>}, {pipeline_mode = #tpu.pipeline_mode<synchronous>, transform_indices = @transform_1, window_bounds = array<i64: 8, 1>}, {pipeline_mode = #tpu.pipeline_mode<synchronous>, transform_indices = @transform_2, window_bounds = array<i64: 8, 1>}, {transform_indices = @transform_3, window_bounds = array<i64: 8, 512>}]} {
    %c0 = arith.constant 0 : index
    %c0_0 = arith.constant 0 : index
    %0 = vector.load %arg1[%c0, %c0_0] : memref<8x512xf32, #tpu.memory_space<vmem>>, vector<8x512xf32>
    %c0_1 = arith.constant 0 : index
    %c0_2 = arith.constant 0 : index
    %1 = vector.load %arg2[%c0_1, %c0_2] : memref<8x1xf32, #tpu.memory_space<vmem>>, vector<8x1xf32>
    %2 = vector.broadcast %1 : vector<8x1xf32> to vector<8x512xf32>
    %3 = arith.mulf %0, %2 : vector<8x512xf32>
    %c0_3 = arith.constant 0 : index
    %c0_4 = arith.constant 0 : index
    %4 = vector.load %arg3[%c0_3, %c0_4] : memref<8x1xf32, #tpu.memory_space<vmem>>, vector<8x1xf32>
    %5 = vector.broadcast %4 : vector<8x1xf32> to vector<8x512xf32>
    %6 = arith.addf %3, %5 : vector<8x512xf32>
    %cst = arith.constant 0.000000e+00 : f32
    %7 = vector.broadcast %cst : f32 to vector<8x512xf32>
    %8 = arith.maximumf %6, %7 : vector<8x512xf32>
    %c0_5 = arith.constant 0 : index
    %c0_6 = arith.constant 0 : index
    %9 = vector.load %arg4[%c0_5, %c0_6] : memref<8x512xf32, #tpu.memory_space<vmem>>, vector<8x512xf32>
    tpu.vector_store %arg4[%c0_5, %c0_6], %8 {strides = array<i32>} : memref<8x512xf32, #tpu.memory_space<vmem>>, vector<8x512xf32>,
    return
  }
  func.func @transform_0(%arg0: i32) -> (i32, i32) {
    %c0_i32 = arith.constant 0 : i32
    %c0_i32_0 = arith.constant 0 : i32
    return %c0_i32, %arg0 : i32, i32
  }
  func.func @transform_1(%arg0: i32) -> (i32, i32) {
    %c0_i32 = arith.constant 0 : i32
    %c0_i32_0 = arith.constant 0 : i32
    %c0_i32_1 = arith.constant 0 : i32
    return %c0_i32, %c0_i32_0 : i32, i32
  }
  func.func @transform_2(%arg0: i32) -> (i32, i32) {
    %c0_i32 = arith.constant 0 : i32
    %c0_i32_0 = arith.constant 0 : i32
    %c0_i32_1 = arith.constant 0 : i32
    return %c0_i32, %c0_i32_0 : i32, i32
  }
  func.func @transform_3(%arg0: i32) -> (i32, i32) {
    %c0_i32 = arith.constant 0 : i32
    %c0_i32_0 = arith.constant 0 : i32
    return %c0_i32, %arg0 : i32, i32
  }
}

</mosaic_0001>

<bundles_post_ra>
// kernel: basic_conv.3
= control target key start
LH: loop header
LB: loop body
LE: loop exit
PB: predicated region body
PF: predicated region fallthrough
CT: control target
= control target key end

     0   :  { %v52_v0 = vmov 0   ;;  %s103_s1 = inlined_call_operand.vmem [shape: f32[8,1], index: 1, kind: input, shape index: {}]   ;;  %s104_s2 = inlined_call_operand.vmem [shape: f32[8,1], index: 2, kind: input, shape index: {}]   ;;  %s105_s0 = inlined_call_operand.vmem [shape: f32[8,512], index: 0, kind: input, shape index: {}, may-alias: {0,3}]   ;;  %s106_s3 = inlined_call_operand.vmem [shape: f32[8,512], index: 3, kind: output, shape index: {}, may-alias: {0,3}]  }
   0x1   :  { %51 = vset.pattern.permute.xlu0 %v52_v0  ;;  %v18_v1 = vld [vmem:[%s103_s1] sm:$0xff]  ;;  %v15_v5 = vld [vmem:[%s105_s0 + $0x8] sm:$0xff]  ;;  %v16_v6 = vld [vmem:[%s105_s0 + $0x10] sm:$0xff] }
   0x2   :  { %21 = vperm.xlu0 %51, %v18_v1   ;;  %v28_v2 = vld [vmem:[%s104_s2] sm:$0xff]  ;;  %v17_v7 = vld [vmem:[%s105_s0 + $0x18] sm:$0xff] }
   0x3   :  { %v14_v4 = vld [vmem:[%s105_s0] sm:$0xff] }
   0xa   :  { %31 = vperm.xlu0 %51, %v28_v2  }
  0x74   :  { %v22_v3 = vpop.permute.xlu0 %21 }
  0x75   :  { %v24_v8 = vmul.f32 %v22_v3, %v14_v4  ;;  %v25_v9 = vmul.f32 %v22_v3, %v15_v5  ;;  %v26_v10 = vmul.f32 %v22_v3, %v16_v6  ;;  %v27_v11 = vmul.f32 %v22_v3, %v17_v7 }
  0x7c   :  { %v32_v12 = vpop.permute.xlu0 %31 }
  0x7d   :  { %v34_v13 = vadd.f32 %v32_v12, %v24_v8  ;;  %v35_v14 = vadd.f32 %v32_v12, %v25_v9  ;;  %v36_v15 = vadd.f32 %v32_v12, %v26_v10  ;;  %v37_v16 = vadd.f32 %v32_v12, %v27_v11 }
  0x7f   :  { %v38_v17 = vmax.f32 %v34_v13, 0.0  ;;  %v39_v18 = vmax.f32 %v35_v14, 0.0  ;;  %v40_v19 = vmax.f32 %v36_v15, 0.0  ;;  %v41_v20 = vmax.f32 %v37_v16, 0.0 }
  0x81   :  { %42 = vst [vmem:[%s106_s3] sm:$0xff] %v38_v17 }
  0x82   :  { %43 = vst [vmem:[%s106_s3 + $0x8] sm:$0xff] %v39_v18 }
  0x83   :  { %44 = vst [vmem:[%s106_s3 + $0x10] sm:$0xff] %v40_v19 }
  0x84   :  { %45 = vst [vmem:[%s106_s3 + $0x18] sm:$0xff] %v41_v20 }

// kernel: basic_conv.2
= control target key start
LH: loop header
LB: loop body
LE: loop exit
PB: predicated region body
PF: predicated region fallthrough
CT: control target
= control target key end

     0   :  { %vm80_vm0 = vcmask 1043456   ;;  %vm76_vm1 = vcmask 326656   ;;  %vm154_vm2 = vcmask 7168   ;;  %s326_s0 = inlined_call_operand.vmem [shape: bf16[40,512], index: 0, kind: input, shape index: {}]   ;;  %s327_s1 = inlined_call_operand.vmem [shape: bf16[8,40], index: 1, kind: input, shape index: {}]   ;;  %s328_s2 = inlined_call_operand.vmem [shape: f32[8,512], index: 2, kind: output, shape index: {0}]   ;;  %s329_s3 = inlined_call_operand.vmem [shape: f32[1,8,1], index: 3, kind: output, shape index: {1}]   ;;  %s330_s4 = inlined_call_operand.vmem [shape: f32[1,8,1], index: 4, kind: output, shape index: {2}]  }
   0x1   :  { %v24_v0 = vld [vmem:[%s326_s0 + $0x40] sm:$0xff]  ;;  %v25_v1 = vld [vmem:[%s326_s0 + $0x48] sm:$0xff]  ;;  %v220_v7 = vld [vmem:[%s326_s0 + $0x2c] sm:$0xf0] }
   0x2   :  { %v52_v2 = vunpack.c.l.b16 %v24_v0  ;;  %v53_v3 = vunpack.c.h.b16 %v24_v0  ;;  %v54_v4 = vunpack.c.l.b16 %v25_v1  ;;  %v55_v5 = vunpack.c.h.b16 %v25_v1  ;;  %v196_v6 = vld [vmem:[%s326_s0 + $0x20] sm:$0xf]  ;;  %v218_v12 = vld [vmem:[%s326_s0 + $0x24] sm:$0xf]  ;;  %v198_v13 = vld [vmem:[%s326_s0 + $0x30] sm:$0xf0] }
   0x3   :  { %v204_v14 = vld [vmem:[%s326_s0 + $0x28] sm:$0xf]  ;;  %v221_v15 = vld [vmem:[%s326_s0 + $0x34] sm:$0xf0]  ;;  %v219_v16 = vld [vmem:[%s326_s0 + $0x2c] sm:$0xf]  ;;  %v197_v22 = vor.u32 %v220_v7, %v196_v6  ;;  %v201_v23 = vor.u32 %v218_v12, %v198_v13 }
   0x4   :  { %v64_v8 = vpack.c.b16 %v52_v2, %v52_v2  ;;  %v65_v9 = vpack.c.b16 %v53_v3, %v53_v3  ;;  %v66_v10 = vpack.c.b16 %v54_v4, %v54_v4  ;;  %v67_v11 = vpack.c.b16 %v55_v5, %v55_v5  ;;  %v206_v17 = vld [vmem:[%s326_s0 + $0x38] sm:$0xf0]  ;;  %v180_v24 = vld [vmem:[%s326_s0] sm:$0xf]  ;;  %v216_v25 = vld [vmem:[%s326_s0 + $0xc] sm:$0xf0] }
   0x5   :  { %v205_v26 = vor.u32 %v221_v15, %v204_v14  ;;  %v209_v27 = vor.u32 %v219_v16, %v206_v17  ;;  %v214_v28 = vld [vmem:[%s326_s0 + $0x4] sm:$0xf]  ;;  %v182_v29 = vld [vmem:[%s326_s0 + $0x10] sm:$0xf0]  ;;  %v188_v30 = vld [vmem:[%s326_s0 + $0x8] sm:$0xf]  ;;  %v181_v34 = vor.u32 %v216_v25, %v180_v24 }
   0x6   :  { %v82_v18 = vsel %vm80_vm0, %v64_v8, 0  ;;  %v85_v19 = vsel %vm80_vm0, %v65_v9, 0  ;;  %v88_v20 = vsel %vm80_vm0, %v66_v10, 0  ;;  %v91_v21 = vsel %vm80_vm0, %v67_v11, 0  ;;  %v217_v31 = vld [vmem:[%s326_s0 + $0x14] sm:$0xf0] }
   0x7   :  { %98 = vmatpush.bf16.msra.mxu0 %v82_v18  ;;  %111 = vmatpush.bf16.msra.mxu1 %v85_v19  ;;  %v215_v32 = vld [vmem:[%s326_s0 + $0xc] sm:$0xf]  ;;  %v190_v33 = vld [vmem:[%s326_s0 + $0x18] sm:$0xf0]  ;;  %v185_v35 = vor.u32 %v214_v28, %v182_v29  ;;  %v189_v36 = vor.u32 %v217_v31, %v188_v30  ;;  %v15_v38 = vld [vmem:[%s327_s1] sm:$0xf] }
   0x8   :  { %124 = vmatpush.bf16.msra.mxu2 %v88_v20  ;;  %137 = vmatpush.bf16.msra.mxu3 %v91_v21  ;;  %v193_v37 = vor.u32 %v215_v32, %v190_v33 }
   0xb   :  { %99 = vmatpush.bf16.msra.mxu0 %v197_v22  ;;  %112 = vmatpush.bf16.msra.mxu1 %v201_v23 }
   0xc   :  { %125 = vmatpush.bf16.msra.mxu2 %v205_v26  ;;  %138 = vmatpush.bf16.msra.mxu3 %v209_v27 }
   0xf   :  { %100 = vmatpush.bf16.msra.mxu0 %v181_v34  ;;  %113 = vmatpush.bf16.msra.mxu1 %v185_v35 }
  0x10   :  { %126 = vmatpush.bf16.msra.mxu2 %v189_v36  ;;  %139 = vmatpush.bf16.msra.mxu3 %v193_v37 }
  0x12   :  { %210 = vmatmul.msk.bf16.vlgmr.msra.gmra.mxu0 %vm76_vm1, %v15_v38  ;;  %211 = vmatmul.msk.bf16.vlgmr.msra.gmra.mxu1 %vm76_vm1, %v15_v38 }
  0x13   :  { %212 = vmatmul.msk.bf16.vlgmr.msra.gmra.mxu2 %vm76_vm1, %v15_v38  ;;  %213 = vmatmul.msk.bf16.vlgmr.msra.gmra.mxu3 %vm76_vm1, %v15_v38 }
  0x8f   :  { %v102_v39 = vpop.f32.mrf.mxu0  ;;  %v115_v40 = vpop.f32.mrf.mxu1 }
  0x90   :  { %145 = vst [vmem:[%s328_s2] sm:$0xff] %v102_v39  ;;  %v149_v41 = vadd.f32 %v115_v40, %v102_v39  ;;  %v156_v42 = vmul.f32 %v102_v39, %v102_v39  ;;  %v157_v43 = vmul.f32 %v115_v40, %v115_v40 }
  0x91   :  { %146 = vst [vmem:[%s328_s2 + $0x8] sm:$0xff] %v115_v40 }
  0x92   :  { %v160_v51 = vadd.f32 %v157_v43, %v156_v42 }
  0x96   :  { %v128_v44 = vpop.f32.mrf.mxu2  ;;  %v141_v45 = vpop.f32.mrf.mxu3 }
  0x97   :  { %147 = vst [vmem:[%s328_s2 + $0x10] sm:$0xff] %v128_v44  ;;  %v104_v46 = vpop.f32.mrf.mxu0  ;;  %v117_v47 = vpop.f32.mrf.mxu1  ;;  %v150_v48 = vadd.f32 %v149_v41, %v128_v44  ;;  %v158_v49 = vmul.f32 %v128_v44, %v128_v44  ;;  %v159_v52 = vmul.f32 %v141_v45, %v141_v45 }
  0x98   :  { %148 = vst [vmem:[%s328_s2 + $0x18] sm:$0xff] %v141_v45 }
  0x99   :  { %v151_v50 = vadd.f32 %v150_v48, %v141_v45  ;;  %v161_v53 = vadd.f32 %v160_v51, %v158_v49 }
  0x9b   :  { %152 = vadd.xlane.f32.xlu0 %v151_v50  ;;  %v162_v56 = vadd.f32 %v161_v53, %v159_v52 }
  0x9e   :  { %v130_v54 = vpop.f32.mrf.mxu2  ;;  %v143_v55 = vpop.f32.mrf.mxu3 }
  0xa3   :  { %163 = vadd.xlane.f32.xlu0 %v162_v56 }
 0x10e   :  { %v153_v57 = vpop.xlane.xlu0 %152 }
 0x10f   :  { %155 = vst.msk [vmem:[%s329_s3] sm:$0xff] %vm154_vm2, %v153_v57 }
 0x116   :  { %v164_v58 = vpop.xlane.xlu0 %163 }
 0x117   :  { %165 = vst.msk [vmem:[%s330_s4] sm:$0xff] %vm154_vm2, %v164_v58 }

</bundles_post_ra>
